<compile_context>
chip_gen: v6e
topology: v6e:2x2x1
jax: 0.10.0
libtpu: 0.0.40
codegen_flags: <defaults>
</compile_context>

<pallas_src>
import functools

import jax
import jax.numpy as jnp
from jax.experimental import pallas as pl
from jax.experimental.pallas import tpu as pltpu


def _round_up(x, m):
    return -(-x // m) * m


def _focal_tversky_partials_kernel(x_ref, t_ref, tp_ref, sp_ref, cnt_ref, *,
                                   n_ch, ignore_index, pad_label, approx_recip):
    """Grid = (B, n_split, tiles).  Kernel views:
         x (C, rows, 128) logits, t (rows, 128) int labels,
         tp/sp/cnt (C, 8, 128) f32 partial-sum accumulators (outputs)."""
    s = pl.program_id(2)

    @pl.when(s == 0)
    def _init():
        tp_ref[...] = jnp.zeros_like(tp_ref)
        sp_ref[...] = jnp.zeros_like(sp_ref)
        cnt_ref[...] = jnp.zeros_like(cnt_ref)

    rows = t_ref.shape[0]
    r8 = rows // 8

    # Target streamed in its HBM dtype; upcast in VMEM.
    t = t_ref[...].astype(jnp.int32)                          # (rows, 128)
    valid = jnp.logical_and(t != ignore_index, t != 15)
    t_clean = jnp.where(valid, t, 0)

    # Logits streamed in their HBM dtype (bf16 at half bandwidth); upcast here.
    xs = [x_ref[c].astype(jnp.float32) for c in range(n_ch)]  # each (rows, 128)

    # Softmax over channels: the channel axis is the leading (non-vreg) dim, so
    # the max/sum reductions are C-1 dense VPU ops per vreg (no XLU).
    m = xs[0]
    for c in range(1, n_ch):
        m = jnp.maximum(m, xs[c])
    es = [jnp.exp(xc - m) for xc in xs]                        # EUP
    denom = es[0]
    for c in range(1, n_ch):
        denom = denom + es[c]
    inv = pl.reciprocal(denom, approx=approx_recip)            # EUP slot

    if pad_label is not None:
        # Spatial padding added by the wrapper contributes nothing anywhere:
        # fold the pad mask into the reciprocal (tp/sum_p use masked p; the
        # sentinel label never matches a class, so cnt is already zero there).
        inv = inv * (t != pad_label).astype(jnp.float32)

    def fold(v):
        # (rows, 128) -> (8, 128): sum sublane groups of 8 via aligned static
        # slices (pure VPU adds).  The final cross-lane reduce happens once,
        # outside the kernel.
        acc = v[0:8]
        for r in range(1, r8):
            acc = acc + v[r * 8:(r + 1) * 8]
        return acc

    for c in range(n_ch):
        p_c = es[c] * inv                                      # (rows, 128)
        hit = t_clean == c                                     # scalar compare, no iota
        tp_ref[c] += fold(jnp.where(hit, p_c, 0.0))
        sp_ref[c] += fold(p_c)
        cnt_ref[c] += fold(hit.astype(jnp.float32))


def focal_tversky_loss(logits_nchw, target_bhw, *, n_classes,
                       alpha=0.5, beta=0.5, gamma=2.0, smooth=1e-7,
                       ignore_index=0, max_tile_pixels=32768,
                       n_split=None, approx_recip=True):
    """Pallas TPU implementation of FocalTverskyLoss.forward."""
    B, C, H, W = logits_nchw.shape
    assert C == n_classes + 1, "input channels must equal n_classes + 1"
    S = H * W
    LANES = 128

    x = logits_nchw.reshape(B, C, S)        # keep HBM dtype (bf16 streams at half BW)
    t = target_bhw.reshape(B, S)            # keep original (possibly narrow) int dtype

    # Sublane alignment required by the streamed dtypes (f32: 8, bf16: 16, int8: 32).
    row_mult = max(32 // x.dtype.itemsize, 32 // t.dtype.itemsize, 8)

    if n_split is None:
        n_split = 2 if B == 1 else 1        # keep both v7x TensorCores busy at B == 1

    n_rows = -(-S // LANES)
    rows_per_split = -(-n_rows // n_split)
    max_rows = max(row_mult, (max_tile_pixels // LANES) // row_mult * row_mult)
    rows_t = min(max_rows, _round_up(rows_per_split, row_mult))
    tiles_per_split = -(-rows_per_split // rows_t)
    n_rows_pad = rows_t * tiles_per_split * n_split
    s_pad = n_rows_pad * LANES

    pad_label = None
    if s_pad != S:
        pad_label = C + 16                  # never a class, never 15, never ignore_index
        if jnp.issubdtype(t.dtype, jnp.integer) and pad_label > jnp.iinfo(t.dtype).max:
            t = t.astype(jnp.int32)
        x = jnp.pad(x, ((0, 0), (0, 0), (0, s_pad - S)))
        t = jnp.pad(t, ((0, 0), (0, s_pad - S)), constant_values=pad_label)

    x = x.reshape(B, C, n_rows_pad, LANES)
    t = t.reshape(B, n_rows_pad, LANES)

    kernel = functools.partial(
        _focal_tversky_partials_kernel,
        n_ch=C, ignore_index=int(ignore_index),
        pad_label=pad_label, approx_recip=bool(approx_recip))

    part_shape = jax.ShapeDtypeStruct((B, n_split, C, 8, LANES), jnp.float32)
    part_spec = pl.BlockSpec((None, None, C, 8, LANES),
                             lambda b, sp, s: (b, sp, 0, 0, 0))

    tp_p, sp_p, cnt_p = pl.pallas_call(
        kernel,
        out_shape=(part_shape, part_shape, part_shape),
        grid_spec=pltpu.PrefetchScalarGridSpec(
            num_scalar_prefetch=0,
            grid=(B, n_split, tiles_per_split),
            in_specs=[
                pl.BlockSpec((None, C, rows_t, LANES),
                             lambda b, sp, s: (b, 0, sp * tiles_per_split + s, 0)),
                pl.BlockSpec((None, rows_t, LANES),
                             lambda b, sp, s: (b, sp * tiles_per_split + s, 0)),
            ],
            out_specs=(part_spec, part_spec, part_spec),
        ),
        compiler_params=pltpu.CompilerParams(
            dimension_semantics=("parallel", "parallel", "arbitrary"),
            vmem_limit_bytes=32 * 1024 * 1024),
    )(x, t)

    # Tiny finalize in XLA: (B, n_split, C, 8, 128) partials -> scalar loss.
    tp = jnp.sum(tp_p, axis=(1, 3, 4))       # (B, C)
    sum_p = jnp.sum(sp_p, axis=(1, 3, 4))
    cnt = jnp.sum(cnt_p, axis=(1, 3, 4))
    fp = sum_p - tp                           # sum(p * (1 - oh)) == sum(p) - tp
    fn = cnt - tp                             # sum((1 - p) * oh) == count(oh) - tp
    tversky = (tp + smooth) / (tp + alpha * fp + beta * fn + smooth)
    return jnp.mean((1.0 - tversky) ** gamma)


def _reference_loss(logits, target, n_classes, alpha=0.5, beta=0.5, gamma=2.0,
                    smooth=1e-7, ignore_index=0):
    """Pure-JAX reference mirroring the PyTorch forward."""
    t = target * jnp.logical_and(target != ignore_index,
                                 target != 15).astype(target.dtype)
    oh = jax.nn.one_hot(t, n_classes + 1, dtype=jnp.float32)   # (B, H, W, C)
    oh = jnp.transpose(oh, (0, 3, 1, 2))                       # (B, C, H, W)
    p = jax.nn.softmax(logits.astype(jnp.float32), axis=1)
    tp = jnp.sum(p * oh, axis=(2, 3))
    fp = jnp.sum(p * (1.0 - oh), axis=(2, 3))
    fn = jnp.sum((1.0 - p) * oh, axis=(2, 3))
    tv = (tp + smooth) / (tp + alpha * fp + beta * fn + smooth)
    return jnp.mean((1.0 - tv) ** gamma)


if __name__ == "__main__":
    N_CLASSES = 4                       # -> C = n_classes + 1 = 5 channels
    C = N_CLASSES + 1
    key = jax.random.PRNGKey(0)
    k1, k2, k3, k4 = jax.random.split(key, 4)

    # Case 1: aligned spatial size, B=2, small forced tiles so the init /
    # accumulate path is exercised across 4 grid steps; exact reciprocal.
    B, H, W = 2, 64, 64
    logits = jax.random.normal(k1, (B, C, H, W), dtype=jnp.float32)
    target = jax.random.randint(k2, (B, H, W), 0, N_CLASSES + 1, dtype=jnp.int32)
    ref = _reference_loss(logits, target, N_CLASSES)
    out = focal_tversky_loss(logits, target, n_classes=N_CLASSES,
                             max_tile_pixels=1024, approx_recip=False)
    out = jax.block_until_ready(out)
    assert jnp.allclose(out, ref, rtol=1e-4, atol=1e-5), (out, ref)

    # Case 2: unaligned spatial size (900 px, padded in the wrapper), B=1 so the
    # spatial axis is split across two "parallel" grid slots (v7x megacore),
    # approximate EUP reciprocal (default) -> slightly looser tolerance.
    B, H, W = 1, 30, 30
    logits2 = jax.random.normal(k3, (B, C, H, W), dtype=jnp.float32)
    target2 = jax.random.randint(k4, (B, H, W), 0, N_CLASSES + 1, dtype=jnp.int32)
    ref2 = _reference_loss(logits2, target2, N_CLASSES)
    out2 = focal_tversky_loss(logits2, target2, n_classes=N_CLASSES)
    out2 = jax.block_until_ready(out2)
    assert jnp.allclose(out2, ref2, rtol=5e-3, atol=5e-3), (out2, ref2)

    print("KERNEL_OK")
</pallas_src>

<mosaic_0001>
module attributes {stable_mosaic.version = 11 : i64} {
  func.func @_focal_tversky_partials_kernel(%arg0: i32, %arg1: i32, %arg2: i32, %arg3: memref<1x5x8x128xf32, #tpu.memory_space<vmem>>, %arg4: memref<1x8x128xi32, #tpu.memory_space<vmem>>, %arg5: memref<1x1x5x8x128xf32, #tpu.memory_space<vmem>>, %arg6: memref<1x1x5x8x128xf32, #tpu.memory_space<vmem>>, %arg7: memref<1x1x5x8x128xf32, #tpu.memory_space<vmem>>) attributes {dimension_semantics = [#tpu.dimension_semantics<parallel>, #tpu.dimension_semantics<parallel>, #tpu.dimension_semantics<arbitrary>], iteration_bounds = array<i64: 2, 1, 4>, scalar_prefetch = 0 : i64, scratch_operands = 0 : i64, tpu.core_type = #tpu.core_type<tc>, window_params = [{transform_indices = @transform_0, window_bounds = array<i64: 1, 5, 8, 128>}, {transform_indices = @transform_1, window_bounds = array<i64: 1, 8, 128>}, {transform_indices = @transform_2, window_bounds = array<i64: 1, 1, 5, 8, 128>}, {transform_indices = @transform_3, window_bounds = array<i64: 1, 1, 5, 8, 128>}, {transform_indices = @transform_4, window_bounds = array<i64: 1, 1, 5, 8, 128>}]} {
    %c0_i32 = arith.constant 0 : i32
    %0 = arith.cmpi eq, %arg2, %c0_i32 : i32
    %1 = arith.extui %0 : i1 to i32
    %c0_i32_0 = arith.constant 0 : i32
    %2 = arith.cmpi ne, %1, %c0_i32_0 : i32
    scf.if %2 {
      %cst_176 = arith.constant 0.000000e+00 : f32
      %166 = vector.broadcast %cst_176 : f32 to vector<5x8x128xf32>
      %c0_177 = arith.constant 0 : index
      %c0_178 = arith.constant 0 : index
      %c0_179 = arith.constant 0 : index
      %c0_180 = arith.constant 0 : index
      %c0_181 = arith.constant 0 : index
      %167 = vector.load %arg5[%c0_177, %c0_178, %c0_179, %c0_180, %c0_181] : memref<1x1x5x8x128xf32, #tpu.memory_space<vmem>>, vector<1x1x5x8x128xf32>
      %168 = vector.shape_cast %167 : vector<1x1x5x8x128xf32> to vector<5x8x128xf32>
      %169 = vector.shape_cast %166 : vector<5x8x128xf32> to vector<1x1x5x8x128xf32>
      tpu.vector_store %arg5[%c0_177, %c0_178, %c0_179, %c0_180, %c0_181], %169 {strides = array<i32>} : memref<1x1x5x8x128xf32, #tpu.memory_space<vmem>>, vector<1x1x5x8x128xf32>,
      %cst_182 = arith.constant 0.000000e+00 : f32
      %170 = vector.broadcast %cst_182 : f32 to vector<5x8x128xf32>
      %c0_183 = arith.constant 0 : index
      %c0_184 = arith.constant 0 : index
      %c0_185 = arith.constant 0 : index
      %c0_186 = arith.constant 0 : index
      %c0_187 = arith.constant 0 : index
      %171 = vector.load %arg6[%c0_183, %c0_184, %c0_185, %c0_186, %c0_187] : memref<1x1x5x8x128xf32, #tpu.memory_space<vmem>>, vector<1x1x5x8x128xf32>
      %172 = vector.shape_cast %171 : vector<1x1x5x8x128xf32> to vector<5x8x128xf32>
      %173 = vector.shape_cast %170 : vector<5x8x128xf32> to vector<1x1x5x8x128xf32>
      tpu.vector_store %arg6[%c0_183, %c0_184, %c0_185, %c0_186, %c0_187], %173 {strides = array<i32>} : memref<1x1x5x8x128xf32, #tpu.memory_space<vmem>>, vector<1x1x5x8x128xf32>,
      %cst_188 = arith.constant 0.000000e+00 : f32
      %174 = vector.broadcast %cst_188 : f32 to vector<5x8x128xf32>
      %c0_189 = arith.constant 0 : index
      %c0_190 = arith.constant 0 : index
      %c0_191 = arith.constant 0 : index
      %c0_192 = arith.constant 0 : index
      %c0_193 = arith.constant 0 : index
      %175 = vector.load %arg7[%c0_189, %c0_190, %c0_191, %c0_192, %c0_193] : memref<1x1x5x8x128xf32, #tpu.memory_space<vmem>>, vector<1x1x5x8x128xf32>
      %176 = vector.shape_cast %175 : vector<1x1x5x8x128xf32> to vector<5x8x128xf32>
      %177 = vector.shape_cast %174 : vector<5x8x128xf32> to vector<1x1x5x8x128xf32>
      tpu.vector_store %arg7[%c0_189, %c0_190, %c0_191, %c0_192, %c0_193], %177 {strides = array<i32>} : memref<1x1x5x8x128xf32, #tpu.memory_space<vmem>>, vector<1x1x5x8x128xf32>,
    } else {
    }
    %c0 = arith.constant 0 : index
    %c0_1 = arith.constant 0 : index
    %c0_2 = arith.constant 0 : index
    %3 = vector.load %arg4[%c0, %c0_1, %c0_2] : memref<1x8x128xi32, #tpu.memory_space<vmem>>, vector<1x8x128xi32>
    %4 = vector.shape_cast %3 : vector<1x8x128xi32> to vector<8x128xi32>
    %c0_i32_3 = arith.constant 0 : i32
    %5 = vector.broadcast %c0_i32_3 : i32 to vector<8x128xi32>
    %6 = arith.cmpi ne, %4, %5 : vector<8x128xi32>
    %c15_i32 = arith.constant 15 : i32
    %7 = vector.broadcast %c15_i32 : i32 to vector<8x128xi32>
    %8 = arith.cmpi ne, %4, %7 : vector<8x128xi32>
    %9 = arith.andi %6, %8 : vector<8x128xi1>
    %c0_i32_4 = arith.constant 0 : i32
    %10 = vector.broadcast %c0_i32_4 : i32 to vector<8x128xi32>
    %11 = arith.select %9, %4, %10 : vector<8x128xi1>, vector<8x128xi32>
    %c0_5 = arith.constant 0 : index
    %c0_6 = arith.constant 0 : index
    %c0_7 = arith.constant 0 : index
    %c0_8 = arith.constant 0 : index
    %12 = vector.load %arg3[%c0_5, %c0_6, %c0_7, %c0_8] : memref<1x5x8x128xf32, #tpu.memory_space<vmem>>, vector<1x1x8x128xf32>
    %13 = vector.shape_cast %12 : vector<1x1x8x128xf32> to vector<8x128xf32>
    %c0_9 = arith.constant 0 : index
    %c1 = arith.constant 1 : index
    %c0_10 = arith.constant 0 : index
    %c0_11 = arith.constant 0 : index
    %14 = vector.load %arg3[%c0_9, %c1, %c0_10, %c0_11] : memref<1x5x8x128xf32, #tpu.memory_space<vmem>>, vector<1x1x8x128xf32>
    %15 = vector.shape_cast %14 : vector<1x1x8x128xf32> to vector<8x128xf32>
    %c0_12 = arith.constant 0 : index
    %c2 = arith.constant 2 : index
    %c0_13 = arith.constant 0 : index
    %c0_14 = arith.constant 0 : index
    %16 = vector.load %arg3[%c0_12, %c2, %c0_13, %c0_14] : memref<1x5x8x128xf32, #tpu.memory_space<vmem>>, vector<1x1x8x128xf32>
    %17 = vector.shape_cast %16 : vector<1x1x8x128xf32> to vector<8x128xf32>
    %c0_15 = arith.constant 0 : index
    %c3 = arith.constant 3 : index
    %c0_16 = arith.constant 0 : index
    %c0_17 = arith.constant 0 : index
    %18 = vector.load %arg3[%c0_15, %c3, %c0_16, %c0_17] : memref<1x5x8x128xf32, #tpu.memory_space<vmem>>, vector<1x1x8x128xf32>
    %19 = vector.shape_cast %18 : vector<1x1x8x128xf32> to vector<8x128xf32>
    %c0_18 = arith.constant 0 : index
    %c4 = arith.constant 4 : index
    %c0_19 = arith.constant 0 : index
    %c0_20 = arith.constant 0 : index
    %20 = vector.load %arg3[%c0_18, %c4, %c0_19, %c0_20] : memref<1x5x8x128xf32, #tpu.memory_space<vmem>>, vector<1x1x8x128xf32>
    %21 = vector.shape_cast %20 : vector<1x1x8x128xf32> to vector<8x128xf32>
    %22 = arith.maximumf %13, %15 : vector<8x128xf32>
    %23 = arith.maximumf %22, %17 : vector<8x128xf32>
    %24 = arith.maximumf %23, %19 : vector<8x128xf32>
    %25 = arith.maximumf %24, %21 : vector<8x128xf32>
    %26 = arith.subf %13, %25 : vector<8x128xf32>
    %27 = math.exp %26 : vector<8x128xf32>
    %28 = arith.subf %15, %25 : vector<8x128xf32>
    %29 = math.exp %28 : vector<8x128xf32>
    %30 = arith.subf %17, %25 : vector<8x128xf32>
    %31 = math.exp %30 : vector<8x128xf32>
    %32 = arith.subf %19, %25 : vector<8x128xf32>
    %33 = math.exp %32 : vector<8x128xf32>
    %34 = arith.subf %21, %25 : vector<8x128xf32>
    %35 = math.exp %34 : vector<8x128xf32>
    %36 = arith.addf %27, %29 : vector<8x128xf32>
    %37 = arith.addf %36, %31 : vector<8x128xf32>
    %38 = arith.addf %37, %33 : vector<8x128xf32>
    %39 = arith.addf %38, %35 : vector<8x128xf32>
    %40 = tpu.reciprocal %39 : vector<8x128xf32> -> vector<8x128xf32>
    %41 = arith.mulf %27, %40 : vector<8x128xf32>
    %c0_i32_21 = arith.constant 0 : i32
    %42 = vector.broadcast %c0_i32_21 : i32 to vector<8x128xi32>
    %43 = arith.cmpi eq, %11, %42 : vector<8x128xi32>
    %c0_22 = arith.constant 0 : index
    %c0_23 = arith.constant 0 : index
    %c0_24 = arith.constant 0 : index
    %c0_25 = arith.constant 0 : index
    %c0_26 = arith.constant 0 : index
    %44 = vector.load %arg5[%c0_22, %c0_23, %c0_24, %c0_25, %c0_26] : memref<1x1x5x8x128xf32, #tpu.memory_space<vmem>>, vector<1x1x1x8x128xf32>
    %45 = vector.shape_cast %44 : vector<1x1x1x8x128xf32> to vector<8x128xf32>
    %cst = arith.constant 0.000000e+00 : f32
    %46 = vector.broadcast %cst : f32 to vector<8x128xf32>
    %47 = arith.select %43, %41, %46 : vector<8x128xi1>, vector<8x128xf32>
    %48 = arith.addf %45, %47 : vector<8x128xf32>
    %c0_27 = arith.constant 0 : index
    %c0_28 = arith.constant 0 : index
    %c0_29 = arith.constant 0 : index
    %c0_30 = arith.constant 0 : index
    %c0_31 = arith.constant 0 : index
    %49 = vector.load %arg5[%c0_27, %c0_28, %c0_29, %c0_30, %c0_31] : memref<1x1x5x8x128xf32, #tpu.memory_space<vmem>>, vector<1x1x1x8x128xf32>
    %50 = vector.shape_cast %49 : vector<1x1x1x8x128xf32> to vector<8x128xf32>
    %51 = vector.shape_cast %48 : vector<8x128xf32> to vector<1x1x1x8x128xf32>
    tpu.vector_store %arg5[%c0_27, %c0_28, %c0_29, %c0_30, %c0_31], %51 {strides = array<i32>} : memref<1x1x5x8x128xf32, #tpu.memory_space<vmem>>, vector<1x1x1x8x128xf32>,
    %c0_32 = arith.constant 0 : index
    %c0_33 = arith.constant 0 : index
    %c0_34 = arith.constant 0 : index
    %c0_35 = arith.constant 0 : index
    %c0_36 = arith.constant 0 : index
    %52 = vector.load %arg6[%c0_32, %c0_33, %c0_34, %c0_35, %c0_36] : memref<1x1x5x8x128xf32, #tpu.memory_space<vmem>>, vector<1x1x1x8x128xf32>
    %53 = vector.shape_cast %52 : vector<1x1x1x8x128xf32> to vector<8x128xf32>
    %54 = arith.addf %53, %41 : vector<8x128xf32>
    %c0_37 = arith.constant 0 : index
    %c0_38 = arith.constant 0 : index
    %c0_39 = arith.constant 0 : index
    %c0_40 = arith.constant 0 : index
    %c0_41 = arith.constant 0 : index
    %55 = vector.load %arg6[%c0_37, %c0_38, %c0_39, %c0_40, %c0_41] : memref<1x1x5x8x128xf32, #tpu.memory_space<vmem>>, vector<1x1x1x8x128xf32>
    %56 = vector.shape_cast %55 : vector<1x1x1x8x128xf32> to vector<8x128xf32>
    %57 = vector.shape_cast %54 : vector<8x128xf32> to vector<1x1x1x8x128xf32>
    tpu.vector_store %arg6[%c0_37, %c0_38, %c0_39, %c0_40, %c0_41], %57 {strides = array<i32>} : memref<1x1x5x8x128xf32, #tpu.memory_space<vmem>>, vector<1x1x1x8x128xf32>,
    %c0_42 = arith.constant 0 : index
    %c0_43 = arith.constant 0 : index
    %c0_44 = arith.constant 0 : index
    %c0_45 = arith.constant 0 : index
    %c0_46 = arith.constant 0 : index
    %58 = vector.load %arg7[%c0_42, %c0_43, %c0_44, %c0_45, %c0_46] : memref<1x1x5x8x128xf32, #tpu.memory_space<vmem>>, vector<1x1x1x8x128xf32>
    %59 = vector.shape_cast %58 : vector<1x1x1x8x128xf32> to vector<8x128xf32>
    %60 = arith.extui %43 : vector<8x128xi1> to vector<8x128xi32>
    %61 = arith.sitofp %60 : vector<8x128xi32> to vector<8x128xf32>
    %62 = arith.addf %59, %61 : vector<8x128xf32>
    %c0_47 = arith.constant 0 : index
    %c0_48 = arith.constant 0 : index
    %c0_49 = arith.constant 0 : index
    %c0_50 = arith.constant 0 : index
    %c0_51 = arith.constant 0 : index
    %63 = vector.load %arg7[%c0_47, %c0_48, %c0_49, %c0_50, %c0_51] : memref<1x1x5x8x128xf32, #tpu.memory_space<vmem>>, vector<1x1x1x8x128xf32>
    %64 = vector.shape_cast %63 : vector<1x1x1x8x128xf32> to vector<8x128xf32>
    %65 = vector.shape_cast %62 : vector<8x128xf32> to vector<1x1x1x8x128xf32>
    tpu.vector_store %arg7[%c0_47, %c0_48, %c0_49, %c0_50, %c0_51], %65 {strides = array<i32>} : memref<1x1x5x8x128xf32, #tpu.memory_space<vmem>>, vector<1x1x1x8x128xf32>,
    %66 = arith.mulf %29, %40 : vector<8x128xf32>
    %c1_i32 = arith.constant 1 : i32
    %67 = vector.broadcast %c1_i32 : i32 to vector<8x128xi32>
    %68 = arith.cmpi eq, %11, %67 : vector<8x128xi32>
    %c0_52 = arith.constant 0 : index
    %c0_53 = arith.constant 0 : index
    %c1_54 = arith.constant 1 : index
    %c0_55 = arith.constant 0 : index
    %c0_56 = arith.constant 0 : index
    %69 = vector.load %arg5[%c0_52, %c0_53, %c1_54, %c0_55, %c0_56] : memref<1x1x5x8x128xf32, #tpu.memory_space<vmem>>, vector<1x1x1x8x128xf32>
    %70 = vector.shape_cast %69 : vector<1x1x1x8x128xf32> to vector<8x128xf32>
    %cst_57 = arith.constant 0.000000e+00 : f32
    %71 = vector.broadcast %cst_57 : f32 to vector<8x128xf32>
    %72 = arith.select %68, %66, %71 : vector<8x128xi1>, vector<8x128xf32>
    %73 = arith.addf %70, %72 : vector<8x128xf32>
    %c0_58 = arith.constant 0 : index
    %c0_59 = arith.constant 0 : index
    %c1_60 = arith.constant 1 : index
    %c0_61 = arith.constant 0 : index
    %c0_62 = arith.constant 0 : index
    %74 = vector.load %arg5[%c0_58, %c0_59, %c1_60, %c0_61, %c0_62] : memref<1x1x5x8x128xf32, #tpu.memory_space<vmem>>, vector<1x1x1x8x128xf32>
    %75 = vector.shape_cast %74 : vector<1x1x1x8x128xf32> to vector<8x128xf32>
    %76 = vector.shape_cast %73 : vector<8x128xf32> to vector<1x1x1x8x128xf32>
    tpu.vector_store %arg5[%c0_58, %c0_59, %c1_60, %c0_61, %c0_62], %76 {strides = array<i32>} : memref<1x1x5x8x128xf32, #tpu.memory_space<vmem>>, vector<1x1x1x8x128xf32>,
    %c0_63 = arith.constant 0 : index
    %c0_64 = arith.constant 0 : index
    %c1_65 = arith.constant 1 : index
    %c0_66 = arith.constant 0 : index
    %c0_67 = arith.constant 0 : index
    %77 = vector.load %arg6[%c0_63, %c0_64, %c1_65, %c0_66, %c0_67] : memref<1x1x5x8x128xf32, #tpu.memory_space<vmem>>, vector<1x1x1x8x128xf32>
    %78 = vector.shape_cast %77 : vector<1x1x1x8x128xf32> to vector<8x128xf32>
    %79 = arith.addf %78, %66 : vector<8x128xf32>
    %c0_68 = arith.constant 0 : index
    %c0_69 = arith.constant 0 : index
    %c1_70 = arith.constant 1 : index
    %c0_71 = arith.constant 0 : index
    %c0_72 = arith.constant 0 : index
    %80 = vector.load %arg6[%c0_68, %c0_69, %c1_70, %c0_71, %c0_72] : memref<1x1x5x8x128xf32, #tpu.memory_space<vmem>>, vector<1x1x1x8x128xf32>
    %81 = vector.shape_cast %80 : vector<1x1x1x8x128xf32> to vector<8x128xf32>
    %82 = vector.shape_cast %79 : vector<8x128xf32> to vector<1x1x1x8x128xf32>
    tpu.vector_store %arg6[%c0_68, %c0_69, %c1_70, %c0_71, %c0_72], %82 {strides = array<i32>} : memref<1x1x5x8x128xf32, #tpu.memory_space<vmem>>, vector<1x1x1x8x128xf32>,
    %c0_73 = arith.constant 0 : index
    %c0_74 = arith.constant 0 : index
    %c1_75 = arith.constant 1 : index
    %c0_76 = arith.constant 0 : index
    %c0_77 = arith.constant 0 : index
    %83 = vector.load %arg7[%c0_73, %c0_74, %c1_75, %c0_76, %c0_77] : memref<1x1x5x8x128xf32, #tpu.memory_space<vmem>>, vector<1x1x1x8x128xf32>
    %84 = vector.shape_cast %83 : vector<1x1x1x8x128xf32> to vector<8x128xf32>
    %85 = arith.extui %68 : vector<8x128xi1> to vector<8x128xi32>
    %86 = arith.sitofp %85 : vector<8x128xi32> to vector<8x128xf32>
    %87 = arith.addf %84, %86 : vector<8x128xf32>
    %c0_78 = arith.constant 0 : index
    %c0_79 = arith.constant 0 : index
    %c1_80 = arith.constant 1 : index
    %c0_81 = arith.constant 0 : index
    %c0_82 = arith.constant 0 : index
    %88 = vector.load %arg7[%c0_78, %c0_79, %c1_80, %c0_81, %c0_82] : memref<1x1x5x8x128xf32, #tpu.memory_space<vmem>>, vector<1x1x1x8x128xf32>
    %89 = vector.shape_cast %88 : vector<1x1x1x8x128xf32> to vector<8x128xf32>
    %90 = vector.shape_cast %87 : vector<8x128xf32> to vector<1x1x1x8x128xf32>
    tpu.vector_store %arg7[%c0_78, %c0_79, %c1_80, %c0_81, %c0_82], %90 {strides = array<i32>} : memref<1x1x5x8x128xf32, #tpu.memory_space<vmem>>, vector<1x1x1x8x128xf32>,
    %91 = arith.mulf %31, %40 : vector<8x128xf32>
    %c2_i32 = arith.constant 2 : i32
    %92 = vector.broadcast %c2_i32 : i32 to vector<8x128xi32>
    %93 = arith.cmpi eq, %11, %92 : vector<8x128xi32>
    %c0_83 = arith.constant 0 : index
    %c0_84 = arith.constant 0 : index
    %c2_85 = arith.constant 2 : index
    %c0_86 = arith.constant 0 : index
    %c0_87 = arith.constant 0 : index
    %94 = vector.load %arg5[%c0_83, %c0_84, %c2_85, %c0_86, %c0_87] : memref<1x1x5x8x128xf32, #tpu.memory_space<vmem>>, vector<1x1x1x8x128xf32>
    %95 = vector.shape_cast %94 : vector<1x1x1x8x128xf32> to vector<8x128xf32>
    %cst_88 = arith.constant 0.000000e+00 : f32
    %96 = vector.broadcast %cst_88 : f32 to vector<8x128xf32>
    %97 = arith.select %93, %91, %96 : vector<8x128xi1>, vector<8x128xf32>
    %98 = arith.addf %95, %97 : vector<8x128xf32>
    %c0_89 = arith.constant 0 : index
    %c0_90 = arith.constant 0 : index
    %c2_91 = arith.constant 2 : index
    %c0_92 = arith.constant 0 : index
    %c0_93 = arith.constant 0 : index
    %99 = vector.load %arg5[%c0_89, %c0_90, %c2_91, %c0_92, %c0_93] : memref<1x1x5x8x128xf32, #tpu.memory_space<vmem>>, vector<1x1x1x8x128xf32>
    %100 = vector.shape_cast %99 : vector<1x1x1x8x128xf32> to vector<8x128xf32>
    %101 = vector.shape_cast %98 : vector<8x128xf32> to vector<1x1x1x8x128xf32>
    tpu.vector_store %arg5[%c0_89, %c0_90, %c2_91, %c0_92, %c0_93], %101 {strides = array<i32>} : memref<1x1x5x8x128xf32, #tpu.memory_space<vmem>>, vector<1x1x1x8x128xf32>,
    %c0_94 = arith.constant 0 : index
    %c0_95 = arith.constant 0 : index
    %c2_96 = arith.constant 2 : index
    %c0_97 = arith.constant 0 : index
    %c0_98 = arith.constant 0 : index
    %102 = vector.load %arg6[%c0_94, %c0_95, %c2_96, %c0_97, %c0_98] : memref<1x1x5x8x128xf32, #tpu.memory_space<vmem>>, vector<1x1x1x8x128xf32>
    %103 = vector.shape_cast %102 : vector<1x1x1x8x128xf32> to vector<8x128xf32>
    %104 = arith.addf %103, %91 : vector<8x128xf32>
    %c0_99 = arith.constant 0 : index
    %c0_100 = arith.constant 0 : index
    %c2_101 = arith.constant 2 : index
    %c0_102 = arith.constant 0 : index
    %c0_103 = arith.constant 0 : index
    %105 = vector.load %arg6[%c0_99, %c0_100, %c2_101, %c0_102, %c0_103] : memref<1x1x5x8x128xf32, #tpu.memory_space<vmem>>, vector<1x1x1x8x128xf32>
    %106 = vector.shape_cast %105 : vector<1x1x1x8x128xf32> to vector<8x128xf32>
    %107 = vector.shape_cast %104 : vector<8x128xf32> to vector<1x1x1x8x128xf32>
    tpu.vector_store %arg6[%c0_99, %c0_100, %c2_101, %c0_102, %c0_103], %107 {strides = array<i32>} : memref<1x1x5x8x128xf32, #tpu.memory_space<vmem>>, vector<1x1x1x8x128xf32>,
    %c0_104 = arith.constant 0 : index
    %c0_105 = arith.constant 0 : index
    %c2_106 = arith.constant 2 : index
    %c0_107 = arith.constant 0 : index
    %c0_108 = arith.constant 0 : index
    %108 = vector.load %arg7[%c0_104, %c0_105, %c2_106, %c0_107, %c0_108] : memref<1x1x5x8x128xf32, #tpu.memory_space<vmem>>, vector<1x1x1x8x128xf32>
    %109 = vector.shape_cast %108 : vector<1x1x1x8x128xf32> to vector<8x128xf32>
    %110 = arith.extui %93 : vector<8x128xi1> to vector<8x128xi32>
    %111 = arith.sitofp %110 : vector<8x128xi32> to vector<8x128xf32>
    %112 = arith.addf %109, %111 : vector<8x128xf32>
    %c0_109 = arith.constant 0 : index
    %c0_110 = arith.constant 0 : index
    %c2_111 = arith.constant 2 : index
    %c0_112 = arith.constant 0 : index
    %c0_113 = arith.constant 0 : index
    %113 = vector.load %arg7[%c0_109, %c0_110, %c2_111, %c0_112, %c0_113] : memref<1x1x5x8x128xf32, #tpu.memory_space<vmem>>, vector<1x1x1x8x128xf32>
    %114 = vector.shape_cast %113 : vector<1x1x1x8x128xf32> to vector<8x128xf32>
    %115 = vector.shape_cast %112 : vector<8x128xf32> to vector<1x1x1x8x128xf32>
    tpu.vector_store %arg7[%c0_109, %c0_110, %c2_111, %c0_112, %c0_113], %115 {strides = array<i32>} : memref<1x1x5x8x128xf32, #tpu.memory_space<vmem>>, vector<1x1x1x8x128xf32>,
    %116 = arith.mulf %33, %40 : vector<8x128xf32>
    %c3_i32 = arith.constant 3 : i32
    %117 = vector.broadcast %c3_i32 : i32 to vector<8x128xi32>
    %118 = arith.cmpi eq, %11, %117 : vector<8x128xi32>
    %c0_114 = arith.constant 0 : index
    %c0_115 = arith.constant 0 : index
    %c3_116 = arith.constant 3 : index
    %c0_117 = arith.constant 0 : index
    %c0_118 = arith.constant 0 : index
    %119 = vector.load %arg5[%c0_114, %c0_115, %c3_116, %c0_117, %c0_118] : memref<1x1x5x8x128xf32, #tpu.memory_space<vmem>>, vector<1x1x1x8x128xf32>
    %120 = vector.shape_cast %119 : vector<1x1x1x8x128xf32> to vector<8x128xf32>
    %cst_119 = arith.constant 0.000000e+00 : f32
    %121 = vector.broadcast %cst_119 : f32 to vector<8x128xf32>
    %122 = arith.select %118, %116, %121 : vector<8x128xi1>, vector<8x128xf32>
    %123 = arith.addf %120, %122 : vector<8x128xf32>
    %c0_120 = arith.constant 0 : index
    %c0_121 = arith.constant 0 : index
    %c3_122 = arith.constant 3 : index
    %c0_123 = arith.constant 0 : index
    %c0_124 = arith.constant 0 : index
    %124 = vector.load %arg5[%c0_120, %c0_121, %c3_122, %c0_123, %c0_124] : memref<1x1x5x8x128xf32, #tpu.memory_space<vmem>>, vector<1x1x1x8x128xf32>
    %125 = vector.shape_cast %124 : vector<1x1x1x8x128xf32> to vector<8x128xf32>
    %126 = vector.shape_cast %123 : vector<8x128xf32> to vector<1x1x1x8x128xf32>
    tpu.vector_store %arg5[%c0_120, %c0_121, %c3_122, %c0_123, %c0_124], %126 {strides = array<i32>} : memref<1x1x5x8x128xf32, #tpu.memory_space<vmem>>, vector<1x1x1x8x128xf32>,
    %c0_125 = arith.constant 0 : index
    %c0_126 = arith.constant 0 : index
    %c3_127 = arith.constant 3 : index
    %c0_128 = arith.constant 0 : index
    %c0_129 = arith.constant 0 : index
    %127 = vector.load %arg6[%c0_125, %c0_126, %c3_127, %c0_128, %c0_129] : memref<1x1x5x8x128xf32, #tpu.memory_space<vmem>>, vector<1x1x1x8x128xf32>
    %128 = vector.shape_cast %127 : vector<1x1x1x8x128xf32> to vector<8x128xf32>
    %129 = arith.addf %128, %116 : vector<8x128xf32>
    %c0_130 = arith.constant 0 : index
    %c0_131 = arith.constant 0 : index
    %c3_132 = arith.constant 3 : index
    %c0_133 = arith.constant 0 : index
    %c0_134 = arith.constant 0 : index
    %130 = vector.load %arg6[%c0_130, %c0_131, %c3_132, %c0_133, %c0_134] : memref<1x1x5x8x128xf32, #tpu.memory_space<vmem>>, vector<1x1x1x8x128xf32>
    %131 = vector.shape_cast %130 : vector<1x1x1x8x128xf32> to vector<8x128xf32>
    %132 = vector.shape_cast %129 : vector<8x128xf32> to vector<1x1x1x8x128xf32>
    tpu.vector_store %arg6[%c0_130, %c0_131, %c3_132, %c0_133, %c0_134], %132 {strides = array<i32>} : memref<1x1x5x8x128xf32, #tpu.memory_space<vmem>>, vector<1x1x1x8x128xf32>,
    %c0_135 = arith.constant 0 : index
    %c0_136 = arith.constant 0 : index
    %c3_137 = arith.constant 3 : index
    %c0_138 = arith.constant 0 : index
    %c0_139 = arith.constant 0 : index
    %133 = vector.load %arg7[%c0_135, %c0_136, %c3_137, %c0_138, %c0_139] : memref<1x1x5x8x128xf32, #tpu.memory_space<vmem>>, vector<1x1x1x8x128xf32>
    %134 = vector.shape_cast %133 : vector<1x1x1x8x128xf32> to vector<8x128xf32>
    %135 = arith.extui %118 : vector<8x128xi1> to vector<8x128xi32>
    %136 = arith.sitofp %135 : vector<8x128xi32> to vector<8x128xf32>
    %137 = arith.addf %134, %136 : vector<8x128xf32>
    %c0_140 = arith.constant 0 : index
    %c0_141 = arith.constant 0 : index
    %c3_142 = arith.constant 3 : index
    %c0_143 = arith.constant 0 : index
    %c0_144 = arith.constant 0 : index
    %138 = vector.load %arg7[%c0_140, %c0_141, %c3_142, %c0_143, %c0_144] : memref<1x1x5x8x128xf32, #tpu.memory_space<vmem>>, vector<1x1x1x8x128xf32>
    %139 = vector.shape_cast %138 : vector<1x1x1x8x128xf32> to vector<8x128xf32>
    %140 = vector.shape_cast %137 : vector<8x128xf32> to vector<1x1x1x8x128xf32>
    tpu.vector_store %arg7[%c0_140, %c0_141, %c3_142, %c0_143, %c0_144], %140 {strides = array<i32>} : memref<1x1x5x8x128xf32, #tpu.memory_space<vmem>>, vector<1x1x1x8x128xf32>,
    %141 = arith.mulf %35, %40 : vector<8x128xf32>
    %c4_i32 = arith.constant 4 : i32
    %142 = vector.broadcast %c4_i32 : i32 to vector<8x128xi32>
    %143 = arith.cmpi eq, %11, %142 : vector<8x128xi32>
    %c0_145 = arith.constant 0 : index
    %c0_146 = arith.constant 0 : index
    %c4_147 = arith.constant 4 : index
    %c0_148 = arith.constant 0 : index
    %c0_149 = arith.constant 0 : index
    %144 = vector.load %arg5[%c0_145, %c0_146, %c4_147, %c0_148, %c0_149] : memref<1x1x5x8x128xf32, #tpu.memory_space<vmem>>, vector<1x1x1x8x128xf32>
    %145 = vector.shape_cast %144 : vector<1x1x1x8x128xf32> to vector<8x128xf32>
    %cst_150 = arith.constant 0.000000e+00 : f32
    %146 = vector.broadcast %cst_150 : f32 to vector<8x128xf32>
    %147 = arith.select %143, %141, %146 : vector<8x128xi1>, vector<8x128xf32>
    %148 = arith.addf %145, %147 : vector<8x128xf32>
    %c0_151 = arith.constant 0 : index
    %c0_152 = arith.constant 0 : index
    %c4_153 = arith.constant 4 : index
    %c0_154 = arith.constant 0 : index
    %c0_155 = arith.constant 0 : index
    %149 = vector.load %arg5[%c0_151, %c0_152, %c4_153, %c0_154, %c0_155] : memref<1x1x5x8x128xf32, #tpu.memory_space<vmem>>, vector<1x1x1x8x128xf32>
    %150 = vector.shape_cast %149 : vector<1x1x1x8x128xf32> to vector<8x128xf32>
    %151 = vector.shape_cast %148 : vector<8x128xf32> to vector<1x1x1x8x128xf32>
    tpu.vector_store %arg5[%c0_151, %c0_152, %c4_153, %c0_154, %c0_155], %151 {strides = array<i32>} : memref<1x1x5x8x128xf32, #tpu.memory_space<vmem>>, vector<1x1x1x8x128xf32>,
    %c0_156 = arith.constant 0 : index
    %c0_157 = arith.constant 0 : index
    %c4_158 = arith.constant 4 : index
    %c0_159 = arith.constant 0 : index
    %c0_160 = arith.constant 0 : index
    %152 = vector.load %arg6[%c0_156, %c0_157, %c4_158, %c0_159, %c0_160] : memref<1x1x5x8x128xf32, #tpu.memory_space<vmem>>, vector<1x1x1x8x128xf32>
    %153 = vector.shape_cast %152 : vector<1x1x1x8x128xf32> to vector<8x128xf32>
    %154 = arith.addf %153, %141 : vector<8x128xf32>
    %c0_161 = arith.constant 0 : index
    %c0_162 = arith.constant 0 : index
    %c4_163 = arith.constant 4 : index
    %c0_164 = arith.constant 0 : index
    %c0_165 = arith.constant 0 : index
    %155 = vector.load %arg6[%c0_161, %c0_162, %c4_163, %c0_164, %c0_165] : memref<1x1x5x8x128xf32, #tpu.memory_space<vmem>>, vector<1x1x1x8x128xf32>
    %156 = vector.shape_cast %155 : vector<1x1x1x8x128xf32> to vector<8x128xf32>
    %157 = vector.shape_cast %154 : vector<8x128xf32> to vector<1x1x1x8x128xf32>
    tpu.vector_store %arg6[%c0_161, %c0_162, %c4_163, %c0_164, %c0_165], %157 {strides = array<i32>} : memref<1x1x5x8x128xf32, #tpu.memory_space<vmem>>, vector<1x1x1x8x128xf32>,
    %c0_166 = arith.constant 0 : index
    %c0_167 = arith.constant 0 : index
    %c4_168 = arith.constant 4 : index
    %c0_169 = arith.constant 0 : index
    %c0_170 = arith.constant 0 : index
    %158 = vector.load %arg7[%c0_166, %c0_167, %c4_168, %c0_169, %c0_170] : memref<1x1x5x8x128xf32, #tpu.memory_space<vmem>>, vector<1x1x1x8x128xf32>
    %159 = vector.shape_cast %158 : vector<1x1x1x8x128xf32> to vector<8x128xf32>
    %160 = arith.extui %143 : vector<8x128xi1> to vector<8x128xi32>
    %161 = arith.sitofp %160 : vector<8x128xi32> to vector<8x128xf32>
    %162 = arith.addf %159, %161 : vector<8x128xf32>
    %c0_171 = arith.constant 0 : index
    %c0_172 = arith.constant 0 : index
    %c4_173 = arith.constant 4 : index
    %c0_174 = arith.constant 0 : index
    %c0_175 = arith.constant 0 : index
    %163 = vector.load %arg7[%c0_171, %c0_172, %c4_173, %c0_174, %c0_175] : memref<1x1x5x8x128xf32, #tpu.memory_space<vmem>>, vector<1x1x1x8x128xf32>
    %164 = vector.shape_cast %163 : vector<1x1x1x8x128xf32> to vector<8x128xf32>
    %165 = vector.shape_cast %162 : vector<8x128xf32> to vector<1x1x1x8x128xf32>
    tpu.vector_store %arg7[%c0_171, %c0_172, %c4_173, %c0_174, %c0_175], %165 {strides = array<i32>} : memref<1x1x5x8x128xf32, #tpu.memory_space<vmem>>, vector<1x1x1x8x128xf32>,
    return
  }
  func.func @transform_0(%arg0: i32, %arg1: i32, %arg2: i32) -> (i32, i32, i32, i32) {
    %c4_i32 = arith.constant 4 : i32
    %0 = arith.muli %arg1, %c4_i32 : i32
    %1 = arith.addi %0, %arg2 : i32
    %c0_i32 = arith.constant 0 : i32
    %c0_i32_0 = arith.constant 0 : i32
    %c0_i32_1 = arith.constant 0 : i32
    return %arg0, %c0_i32, %1, %c0_i32_0 : i32, i32, i32, i32
  }
  func.func @transform_1(%arg0: i32, %arg1: i32, %arg2: i32) -> (i32, i32, i32) {
    %c4_i32 = arith.constant 4 : i32
    %0 = arith.muli %arg1, %c4_i32 : i32
    %1 = arith.addi %0, %arg2 : i32
    %c0_i32 = arith.constant 0 : i32
    %c0_i32_0 = arith.constant 0 : i32
    return %arg0, %1, %c0_i32 : i32, i32, i32
  }
  func.func @transform_2(%arg0: i32, %arg1: i32, %arg2: i32) -> (i32, i32, i32, i32, i32) {
    %c0_i32 = arith.constant 0 : i32
    %c0_i32_0 = arith.constant 0 : i32
    %c0_i32_1 = arith.constant 0 : i32
    %c0_i32_2 = arith.constant 0 : i32
    return %arg0, %arg1, %c0_i32, %c0_i32_0, %c0_i32_1 : i32, i32, i32, i32, i32
  }
  func.func @transform_3(%arg0: i32, %arg1: i32, %arg2: i32) -> (i32, i32, i32, i32, i32) {
    %c0_i32 = arith.constant 0 : i32
    %c0_i32_0 = arith.constant 0 : i32
    %c0_i32_1 = arith.constant 0 : i32
    %c0_i32_2 = arith.constant 0 : i32
    return %arg0, %arg1, %c0_i32, %c0_i32_0, %c0_i32_1 : i32, i32, i32, i32, i32
  }
  func.func @transform_4(%arg0: i32, %arg1: i32, %arg2: i32) -> (i32, i32, i32, i32, i32) {
    %c0_i32 = arith.constant 0 : i32
    %c0_i32_0 = arith.constant 0 : i32
    %c0_i32_1 = arith.constant 0 : i32
    %c0_i32_2 = arith.constant 0 : i32
    return %arg0, %arg1, %c0_i32, %c0_i32_0, %c0_i32_1 : i32, i32, i32, i32, i32
  }
}

</mosaic_0001>

<bundles_post_ra>
// kernel: tpu_custom_call.1
= control target key start
LH: loop header
LB: loop body
LE: loop exit
PB: predicated region body
PF: predicated region fallthrough
CT: control target
= control target key end

     0   :  { %s1571_s0 = inlined_call_operand.hbm [shape: f32[2,5,32,128], index: 0, kind: input, shape index: {}]   ;;  %s1572_s1 = inlined_call_operand.hbm [shape: s32[2,32,128], index: 1, kind: input, shape index: {}]   ;;  %s1573_s2 = inlined_call_operand.hbm [shape: f32[2,1,5,8,128], index: 2, kind: output, shape index: {0}]   ;;  %s1574_s3 = inlined_call_operand.hbm [shape: f32[2,1,5,8,128], index: 3, kind: output, shape index: {1}]   ;;  %s1575_s4 = inlined_call_operand.hbm [shape: f32[2,1,5,8,128], index: 4, kind: output, shape index: {2}]  }
   0x1   :  { %1587 = sst [smem:[#allocation24_spill]] %s1571_s0 }
   0x2   :  { %1588 = sst [smem:[#allocation25_spill]] %s1573_s2 }
   0x3   :  { %1589 = sst [smem:[#allocation26_spill]] %s1575_s4 }
   0x4   :  { %10 = vsyncpa [#allocation3], 0 }
   0x5   :  { %12 = vsyncpa [#allocation3 + $0x1], 0 }
   0x6   :  { %13 = vsyncpa [#allocation6], 0 }
   0x7   :  { %15 = vsyncpa [#allocation6 + $0x1], 0 }
   0x8   :  { %16 = vsyncpa [#allocation4], 0 }
   0x9   :  { %18 = vsyncpa [#allocation4 + $0x1], 0 }
   0xa   :  { %19 = vsyncpa [#allocation9], 0 }
   0xb   :  { %21 = vsyncpa [#allocation9 + $0x1], 0  ;;  %s1175_s15 = smov 0   ;;  %s1177_s16 = smov 0  }
   0xc   :  { %s1179_s17 = smov 0   ;;  %s1181_s18 = smov 0  }
   0xd   :  { %s1183_s19 = smov 0   ;;  %s1185_s20 = smov 0  }
   0xe   :  { %s1187_s21 = smov 0   ;;  %s1189_s22 = smov 0  }
   0xf   :  { %s1191_s23 = smov 0   ;;  %s1193_s24 = smov 0  }
  0x10   :  { %s1195_s25 = smov 0  }
  0x11 LB: > { %1590 = sst [smem:[#allocation15_spill]] %s1096_s15  ;;  %s1229_s26 = sadd.s32 4294967295, %s1136_s25   ;;  %s1136_s25 = sphi %s1195_s25, %s27_s25   ;;  %s1132_s24 = sphi %s1193_s24, %s1625_s24   ;;  %s1128_s23 = sphi %s1191_s23, %s1624_s23   ;;  %s1124_s22 = sphi %s1189_s22, %s1623_s22   ;;  %s1120_s21 = sphi %s1187_s21, %s1622_s21   ;;  %s1116_s20 = sphi %s1185_s20, %s1615_s20   ;;  %s1112_s19 = sphi %s1183_s19, %s1621_s19   ;;  %s1108_s18 = sphi %s1181_s18, %s1620_s18   ;;  %s1104_s17 = sphi %s1179_s17, %s1613_s17   ;;  %s1100_s16 = sphi %s1177_s16, %s1619_s16   ;;  %s1096_s15 = sphi %s1175_s15, %s1618_s15  }
  0x12   : > { %1591 = sst [smem:[#allocation16_spill]] %s1104_s17  ;;  %s1576_s27 = sadd.s32 4294967294, %s1136_s25  }
  0x13   : > { %1592 = sst [smem:[#allocation17_spill]] %s1116_s20  ;;  %s39_s28 = sadd.s32 1, %s1128_s23 }
  0x14   : > { %s46_s29 = sadd.s32 1, %s1132_s24  ;;  %p40_p0 = scmp.ge.s32.totalorder %s39_s28, 4 }
  0x15   : > { %s59_s30 = sadd.s32 1, %s1116_s20  ;;  %p66_p1 = scmp.ne.s32.totalorder %s1116_s20, %s1112_s19 }
  0x16   : > { %p67_p2 = scmp.eq.s32.totalorder %s1136_s25, 0  ;;  %s1627_s28 = smov (%p40_p0, %s39_s28), 0 }
  0x17   : > { %1593 = sst [smem:[#allocation18_spill]] %s1627_s28  ;;  %s1629_s29 = smov (!%p40_p0, %s46_s29), %s1132_s24 }
  0x18   : > { %s55_s5 = ssub.s32 %s1128_s23, %s1627_s28  ;;  %p1243_p3 = por %p67_p2, %p66_p1 }
  0x19   : > { %p48_p4 = scmp.ge.s32.totalorder %s1629_s29, 2  ;;  %p72_p5 = scmp.ne.s32.totalorder %s1112_s19, %s1108_s18 }
  0x1a   : > { %p73_p6 = scmp.eq.s32.totalorder %s1229_s26, 0  ;;  %s119_s7 = sadd.s32 1, %s1104_s17 }
  0x1b   : > { %s1631_s29 = smov (%p48_p4, %s1629_s29), 0  ;;  %p129_p8 = scmp.ne.s32.totalorder %s1104_s17, %s1100_s16 }
  0x1c   : > { %1595 = sst [smem:[#allocation19_spill]] %s1631_s29  ;;  %p1252_p7 = por %p73_p6, %p72_p5 }
  0x1d   : > { %s54_s9 = ssub.s32 %s1132_s24, %s1631_s29  ;;  %p130_p9 = scmp.eq.s32.totalorder %s1229_s26, 7 }
  0x1e   : > { %s56_s10 = sor.u32 %s55_s5, %s54_s9  ;;  %p117_p10 = scmp.eq.s32.totalorder %s54_s9, 0 }
  0x1f   : > { %p57_p11 = scmp.eq.s32.totalorder %s56_s10, 0  ;;  %p1261_p12 = por %p130_p9, %p129_p8 }
  0x20   : > { %s1266_s12 = scalar_select %p117_p10, %s1104_s17, %s119_s7  }
  0x21   : > { %s1597_s11 = scalar_select %p1261_p12, 1, 0 }
  0x22   : > { %1599 = sst [smem:[#allocation21_spill]] %s1266_s12  ;;  %p135_p13 = scmp.ne.s32.totalorder %s1100_s16, %s1096_s15 }
  0x23   : > { %1598 = sst [smem:[#allocation20_spill]] %s1597_s11  ;;  %p136_p0 = scmp.eq.s32.totalorder %s1576_s27, 7 }
  0x24   : > { %s1269_s13 = scalar_select %p57_p11, %s1116_s20, %s59_s30  }
  0x25   : > { %p791_p1 = scmp.lt.s32.totalorder %s1136_s25, 8  ;;  %p1276_p2 = por %p136_p0, %p135_p13 }
  0x26   : > { %1600 = sst [smem:[#allocation22_spill]] %s1269_s13  ;;  %s1281_s18 = sand.u32 1, %s1116_s20  }
  0x27   : > { %s1601_s14 = scalar_select %p1276_p2, 1, 0 }
  0x28   : > { %s757_s5 = smul.u32 40, %s1281_s18  ;;  %p1287_p4 = pnand %p791_p1, %p1243_p3 }
  0x29   : > { %1602 = sst [smem:[#allocation23_spill]] %s1601_s14  ;;  %s758_s9 = smul.u32 20, %s1132_s24 }
  0x2a   : > { %s216_s10 = scalar_lea.vmem [#allocation2], %s757_s5  ;;  %s1604_s0 = sld [smem:[#allocation24_spill]] }
  0x2b   : > { %s223_s30 = sadd.s32 %s1128_s23, %s758_s9  ;;  %s226_s27 = sshll.u32 %s216_s10, 4  ;;  %s227_s27 = int_to_ptr.vmem [resolvable:$true] %s226_s27 }
  0x2c   : > { %s712_s29 = sshll.u32 %s223_s30, 7  ;;  %s213_s12 = scalar_lea.sflag [#allocation3], %s1281_s18 }
  0x2d   : > { %p902_p5 = pneg %p1287_p4  ;;  %s913_s17 = scalar_lea.vmem %s227_s27, 640 }
  0x2e   : > { %p914_p6 = scmp.ne.s32.totalorder %s227_s27, %s913_s17  ;;  %s1138_s6 = smov [#allocation2]  }
  0x2f   : > { %s918_s14 = sshll.u32 %s1138_s6, 4  ;;  %s919_s14 = int_to_ptr.vmem [resolvable:$false] %s918_s14 }
  0x30   : > { %s225_s20 = scalar_lea.hbm %s1604_s0, %s712_s29  ;;  %p916_p3 = pnand %p914_p6, %p902_p5 }
  0x31   : > { %s920_s5 = scalar_lea.vmem %s919_s14, 1280  ;;  %p921_p9 = scmp.lt.s32.totalorder %s227_s27, %s919_s14 }
  0x32   : > { %p917_p8 = pneg %p916_p3  ;;  %p922_p10 = scmp.lt.s32.totalorder %s920_s5, %s913_s17 }
  0x34   : > { %p923_p11 = por %p922_p10, %p921_p9 }
  0x36   : > { %p924_p13 = pnand %p923_p11, %p917_p8 }
  0x38   : > { %927 = shalt.err (!%p924_p13)
}
  0x39   : > { %s1139_s28 = smov 512   ;;  %s1140_s29 = smov 128  }
  0x3a   : > { %s1141_s13 = smov 8   ;;  %p716_p0 = scmp.ge.s32.totalorder %s1136_s25, 1 }
  0x3b   : > { %777 = dma.hbm_to_vmem [thread:$0]  (!%p1287_p4), %s225_s20, 640, %s227_s27, %s213_s12, %s1139_s28, %s1140_s29, %s1141_s13  }
  0x3c   : > { %p256_p1 = scmp.lt.s32.totalorder %s1136_s25, 9  ;;  %s713_s14 = sshll.u32 %s1281_s18, 3 }
  0x3d   : > { %s714_s9 = sshll.u32 %s1132_s24, 2  ;;  %s240_s30 = scalar_lea.vmem [#allocation5], %s713_s14 }
  0x3e   : > { %p1306_p6 = pnand %p716_p0, %p256_p1  ;;  %s251_s10 = sshll.u32 %s240_s30, 4  ;;  %s252_s10 = int_to_ptr.vmem [resolvable:$true] %s251_s10 }
  0x3f   : > { %s247_s6 = sadd.s32 %s1128_s23, %s714_s9  ;;  %s237_s4 = scalar_lea.sflag [#allocation6], %s1281_s18 }
  0x40   : > { %s715_s5 = sshll.u32 %s247_s6, 7  ;;  %s941_s11 = scalar_lea.vmem %s252_s10, 128 }
  0x41   : > { %s249_s2 = scalar_lea.hbm %s1572_s1, %s715_s5  ;;  %p942_p3 = scmp.ne.s32.totalorder %s252_s10, %s941_s11 }
  0x42   : > { %s1142_s20 = smov [#allocation5]  }
  0x43   : > { %p944_p8 = pnand %p942_p3, %p902_p5  ;;  %s946_s27 = sshll.u32 %s1142_s20, 4  ;;  %s947_s27 = int_to_ptr.vmem [resolvable:$false] %s946_s27 }
  0x44   : > { %s948_s12 = scalar_lea.vmem %s947_s27, 256  ;;  %p949_p10 = scmp.lt.s32.totalorder %s252_s10, %s947_s27 }
  0x45   : > { %p945_p9 = pneg %p944_p8  ;;  %p950_p11 = scmp.lt.s32.totalorder %s948_s12, %s941_s11 }
  0x47   : > { %p951_p13 = por %p950_p11, %p949_p10 }
  0x49   : > { %p952_p0 = pnand %p951_p13, %p945_p9 }
  0x4b   : > { %955 = shalt.err (!%p952_p0)
}
  0x4c   : > { %780 = dma.hbm_to_vmem [thread:$0]  (!%p1287_p4), %s249_s2, 128, %s252_s10, %s237_s4  }
  0x4d   : > { %260 = sbr.rel (%p1306_p6) target bundleno = 223 (0xdf), region = 28  ;;  %s262_s0 = sand.u32 (!%p1306_p6), 1, %s1112_s19  }
  0x4e   : > { %s759_s15 = smul.u32 (!%p1306_p6), 40, %s262_s0  ;;  %s263_s18 = scalar_lea.sflag (!%p1306_p6), [#allocation3], %s262_s0 }
  0x50   : > { %s1324_s28 = scalar_lea.vmem (!%p1306_p6), [#allocation2], %s759_s15 }
  0x52   : > { %1079 = dma.done.wait (%p1252_p7), %s263_s18, 640  }
  0x53   : > { %1081 = vsyncadd (%p1252_p7), %s263_s18, 4294966656  ;;  %s717_s11 = sshll.u32 %s262_s0, 3  ;;  %s272_s29 = scalar_lea.sflag [#allocation6], %s262_s0 }
  0x54   : > { %s1330_s7 = scalar_lea.vmem [#allocation5], %s717_s11 }
  0x55   : > { %1083 = dma.done.wait (%p1252_p7), %s272_s29, 128  }
  0x56   : > { %1085 = vsyncadd (%p1252_p7), %s272_s29, 4294967168  ;;  %s298_s2 = sand.u32 1, %s1100_s16   ;;  %p718_p4 = scmp.ne.s32.totalorder %s1120_s21, 0 }
  0x57   : > { %s760_s4 = smul.u32 40, %s298_s2 }
  0x58   : > { %322 = sbr.rel (%p718_p4) target bundleno = 102 (0x66), region = 40 }
  0x59   : > { %s1339_s13 = scalar_lea.vmem [#allocation7], %s760_s4  ;;  %s1341_s14 = scalar_lea.vmem [#allocation8], %s760_s4 }
  0x5a   : > { %s1343_s17 = scalar_lea.vmem [#allocation10], %s760_s4 }
  0x5d   : > { %v1143_v0 = vmov 0.0  }
  0x5e   : > { %323 = vst [vmem:[%s1339_s13] sm:$0xff] %v1143_v0  ;;  %324 = vst [vmem:[%s1339_s13 + $0x8] sm:$0xff] %v1143_v0 }
  0x5f   : > { %325 = vst [vmem:[%s1339_s13 + $0x10] sm:$0xff] %v1143_v0  ;;  %326 = vst [vmem:[%s1339_s13 + $0x18] sm:$0xff] %v1143_v0 }
  0x60   : > { %327 = vst [vmem:[%s1339_s13 + $0x20] sm:$0xff] %v1143_v0  ;;  %328 = vst [vmem:[%s1341_s14] sm:$0xff] %v1143_v0 }
  0x61   : > { %329 = vst [vmem:[%s1341_s14 + $0x8] sm:$0xff] %v1143_v0  ;;  %330 = vst [vmem:[%s1341_s14 + $0x10] sm:$0xff] %v1143_v0 }
  0x62   : > { %331 = vst [vmem:[%s1341_s14 + $0x18] sm:$0xff] %v1143_v0  ;;  %332 = vst [vmem:[%s1341_s14 + $0x20] sm:$0xff] %v1143_v0 }
  0x63   : > { %333 = vst [vmem:[%s1343_s17] sm:$0xff] %v1143_v0  ;;  %334 = vst [vmem:[%s1343_s17 + $0x8] sm:$0xff] %v1143_v0 }
  0x64   : > { %335 = vst [vmem:[%s1343_s17 + $0x10] sm:$0xff] %v1143_v0  ;;  %336 = vst [vmem:[%s1343_s17 + $0x18] sm:$0xff] %v1143_v0 }
  0x65   : > { %337 = vst [vmem:[%s1343_s17 + $0x20] sm:$0xff] %v1143_v0 }
  0x66 PF: > { %v343_v1 = vld [vmem:[%s1324_s28] sm:$0xff]  ;;  %v719_v2 = vld [vmem:[%s1324_s28 + $0x8] sm:$0xff]  ;;  %v720_v3 = vld [vmem:[%s1324_s28 + $0x10] sm:$0xff]  ;;  %v1144_v15 = vmov 0.0   ;;  %s463_s21 = sand.u32 1, %s1229_s26   ;;  %s1397_s8 = smul.u32 640, %s1124_s22 }
  0x67   : > { %v352_v4 = vmax.f32 %v343_v1, %v719_v2  ;;  %v721_v5 = vld [vmem:[%s1324_s28 + $0x18] sm:$0xff]  ;;  %v338_v7 = vld [vmem:[%s1330_s7] sm:$0xff]  ;;  %v722_v8 = vld [vmem:[%s1324_s28 + $0x20] sm:$0xff]  ;;  %s502_s9 = sshll.u32 %s1341_s14, 4  ;;  %s520_s22 = sshll.u32 %s1343_s17, 4  ;;  %s1423_s9 = int_to_ptr.vmem [resolvable:$true] %s502_s9  ;;  %s1437_s22 = int_to_ptr.vmem [resolvable:$true] %s520_s22 }
  0x68   : > { %vm339_vm0 = vcmp.ne.s32.totalorder %v338_v7, 0  ;;  %vm340_vm1 = vcmp.ne.s32.totalorder %v338_v7, 15  ;;  %v382_v47 = vld [vmem:[%s1341_s14] sm:$0xff]  ;;  %v726_v49 = vld [vmem:[%s1341_s14 + $0x8] sm:$0xff]  ;;  %v733_v50 = vld [vmem:[%s1341_s14 + $0x10] sm:$0xff]  ;;  %s1413_s6 = scalar_lea.hbm %s1574_s3, %s1397_s8  ;;  %s484_s5 = sshll.u32 %s1339_s13, 4  ;;  %s1448_s5 = int_to_ptr.vmem [resolvable:$true] %s484_s5 }
  0x69   : > { %v353_v6 = vmax.f32 %v352_v4, %v720_v3  ;;  %vm341_vm2 = vmand %vm339_vm0, %vm340_vm1  ;;  %v740_v51 = vld [vmem:[%s1341_s14 + $0x18] sm:$0xff]  ;;  %v747_v56 = vld [vmem:[%s1341_s14 + $0x20] sm:$0xff]  ;;  %s1607_s0 = sld [smem:[#allocation26_spill]]  ;;  %s1455_s7 = scalar_lea.sflag [#allocation9], %s463_s21 }
  0x6a   : > { %v1367_v10 = vsel %vm341_vm2, %v338_v7, 0  ;;  %v385_v12 = vld [vmem:[%s1343_s17] sm:$0xff]  ;;  %v728_v13 = vld [vmem:[%s1343_s17 + $0x8] sm:$0xff]  ;;  %v731_v60 = vld [vmem:[%s1339_s13 + $0x10] sm:$0xff]  ;;  %s1608_s11 = sld [smem:[#allocation25_spill]]  ;;  %s956_s4 = scalar_lea.vmem %s1423_s9, 640 }
  0x6b   : > { %v354_v9 = vmax.f32 %v353_v6, %v721_v5  ;;  %vm377_vm3 = vcmp.eq.s32.totalorder %v1367_v10, 0  ;;  %vm391_vm4 = vcmp.eq.s32.totalorder %v1367_v10, 1  ;;  %vm408_vm5 = vcmp.eq.s32.totalorder %v1367_v10, 2  ;;  %v735_v14 = vld [vmem:[%s1343_s17 + $0x10] sm:$0xff]  ;;  %v742_v27 = vld [vmem:[%s1343_s17 + $0x18] sm:$0xff]  ;;  %v378_v58 = vld [vmem:[%s1339_s13] sm:$0xff]  ;;  %p957_p7 = scmp.ne.s32.totalorder %s1423_s9, %s956_s4 }
  0x6c   : > { %v723_v16 = vsel %vm377_vm3, 1.0, %v1144_v15  ;;  %v729_v17 = vsel %vm391_vm4, 1.0, %v1144_v15  ;;  %v736_v18 = vsel %vm408_vm5, 1.0, %v1144_v15  ;;  %vm425_vm6 = vcmp.eq.s32.totalorder %v1367_v10, 3  ;;  %v749_v28 = vld [vmem:[%s1343_s17 + $0x20] sm:$0xff]  ;;  %v724_v59 = vld [vmem:[%s1339_s13 + $0x8] sm:$0xff] }
  0x6d   : > { %v355_v11 = vmax.f32 %v354_v9, %v722_v8  ;;  %v388_v24 = vadd.f32 %v723_v16, %v385_v12  ;;  %v405_v25 = vadd.f32 %v729_v17, %v728_v13  ;;  %v422_v26 = vadd.f32 %v736_v18, %v735_v14  ;;  %v745_v6 = vld [vmem:[%s1339_s13 + $0x20] sm:$0xff]  ;;  %p958_p5 = pnand %p957_p7, %p1261_p12 }
  0x6e   : > { %v743_v33 = vsel %vm425_vm6, 1.0, %v1144_v15  ;;  %vm442_vm7 = vcmp.eq.s32.totalorder %v1367_v10, 4 }
  0x6f   : > { %v356_v19 = vsub.f32 %v343_v1, %v355_v11  ;;  %v359_v20 = vsub.f32 %v719_v2, %v355_v11  ;;  %v362_v21 = vsub.f32 %v720_v3, %v355_v11  ;;  %v365_v22 = vsub.f32 %v721_v5, %v355_v11  ;;  %389 = vst [vmem:[%s1343_s17] sm:$0xff] %v388_v24  ;;  %v738_v1 = vld [vmem:[%s1339_s13 + $0x18] sm:$0xff]  ;;  %s1435_s15 = scalar_lea.hbm %s1607_s0, %s1397_s8  ;;  %p959_p1 = pneg %p958_p5 }
  0x70   : > { %v368_v23 = vsub.f32 %v722_v8, %v355_v11  ;;  %730 = vst [vmem:[%s1343_s17 + $0x8] sm:$0xff] %v405_v25  ;;  %737 = vst [vmem:[%s1343_s17 + $0x10] sm:$0xff] %v422_v26  ;;  %v439_v34 = vadd.f32 %v743_v33, %v742_v27  ;;  %v750_v35 = vsel %vm442_vm7, 1.0, %v1144_v15  ;;  %s1446_s29 = scalar_lea.hbm %s1608_s11, %s1397_s8 }
  0x71   : > { %v357_v29 = vmul.f32 1.442695, %v356_v19  ;;  %v360_v30 = vmul.f32 1.442695, %v359_v20  ;;  %v363_v31 = vmul.f32 1.442695, %v362_v21  ;;  %v456_v37 = vadd.f32 %v750_v35, %v749_v28 }
  0x72   : > { %v366_v32 = vmul.f32 1.442695, %v365_v22  ;;  %v369_v36 = vmul.f32 1.442695, %v368_v23  ;;  %744 = vst [vmem:[%s1343_s17 + $0x18] sm:$0xff] %v439_v34 }
  0x73   : > { %888 = vpow2.f32 %v357_v29  ;;  %751 = vst [vmem:[%s1343_s17 + $0x20] sm:$0xff] %v456_v37 }
  0x74   : > { %890 = vpow2.f32 %v360_v30 }
  0x75   : > { %892 = vpow2.f32 %v363_v31 }
  0x76   : > { %894 = vpow2.f32 %v366_v32 }
  0x77   : > { %896 = vpow2.f32 %v369_v36 }
  0x80   : > { %v889_v38 = vpop.eup %888 }
  0x81   : > { %v891_v39 = vpop.eup %890 }
  0x82   : > { %v893_v40 = vpop.eup %892  ;;  %v371_v41 = vadd.f32 %v891_v39, %v889_v38 }
  0x83   : > { %v895_v42 = vpop.eup %894 }
  0x84   : > { %v372_v43 = vadd.f32 %v893_v40, %v371_v41  ;;  %v897_v44 = vpop.eup %896 }
  0x86   : > { %v373_v45 = vadd.f32 %v895_v42, %v372_v43 }
  0x88   : > { %v374_v46 = vadd.f32 %v897_v44, %v373_v45 }
  0x8a   : > { %898 = vrcp.f32 %v374_v46 }
  0x97   : > { %v899_v48 = vpop.eup %898 }
  0x98   : > { %v376_v52 = vmul.f32 %v899_v48, %v889_v38  ;;  %v390_v53 = vmul.f32 %v899_v48, %v891_v39  ;;  %v407_v54 = vmul.f32 %v899_v48, %v893_v40  ;;  %v424_v55 = vmul.f32 %v899_v48, %v895_v42 }
  0x99   : > { %v441_v57 = vmul.f32 %v899_v48, %v897_v44 }
  0x9a   : > { %v383_v61 = vadd.f32 %v382_v47, %v376_v52  ;;  %v399_v62 = vadd.f32 %v726_v49, %v390_v53  ;;  %v416_v63 = vadd.f32 %v733_v50, %v407_v54  ;;  %v433_v0 = vadd.f32 %v740_v51, %v424_v55 }
  0x9b   : > { %v450_v2 = vadd.f32 %v747_v56, %v441_v57  ;;  %v379_v3 = vsel %vm377_vm3, %v376_v52, 0.0  ;;  %v394_v4 = vsel %vm391_vm4, %v390_v53, 0.0  ;;  %v411_v5 = vsel %vm408_vm5, %v407_v54, 0.0 }
  0x9c   : > { %384 = vst [vmem:[%s1341_s14] sm:$0xff] %v383_v61  ;;  %727 = vst [vmem:[%s1341_s14 + $0x8] sm:$0xff] %v399_v62  ;;  %v380_v7 = vadd.f32 %v379_v3, %v378_v58  ;;  %v395_v8 = vadd.f32 %v724_v59, %v394_v4  ;;  %v412_v9 = vadd.f32 %v731_v60, %v411_v5  ;;  %v428_v11 = vsel %vm425_vm6, %v424_v55, 0.0 }
  0x9d   : > { %734 = vst [vmem:[%s1341_s14 + $0x10] sm:$0xff] %v416_v63  ;;  %741 = vst [vmem:[%s1341_s14 + $0x18] sm:$0xff] %v433_v0  ;;  %v429_v12 = vadd.f32 %v738_v1, %v428_v11  ;;  %v445_v13 = vsel %vm442_vm7, %v441_v57, 0.0 }
  0x9e   : > { %748 = vst [vmem:[%s1341_s14 + $0x20] sm:$0xff] %v450_v2  ;;  %381 = vst [vmem:[%s1339_s13] sm:$0xff] %v380_v7  ;;  %v446_v14 = vadd.f32 %v745_v6, %v445_v13  ;;  %s1145_s14 = smov [#allocation8]  }
  0x9f   : > { %725 = vst [vmem:[%s1339_s13 + $0x8] sm:$0xff] %v395_v8  ;;  %732 = vst [vmem:[%s1339_s13 + $0x10] sm:$0xff] %v412_v9  ;;  %s960_s17 = sshll.u32 %s1145_s14, 4  ;;  %s961_s17 = int_to_ptr.vmem [resolvable:$false] %s960_s17 }
  0xa0   : > { %s962_s30 = scalar_lea.vmem %s961_s17, 1280  ;;  %p963_p6 = scmp.lt.s32.totalorder %s1423_s9, %s961_s17 }
  0xa1   : > { %p964_p3 = scmp.lt.s32.totalorder %s962_s30, %s956_s4 }
  0xa3   : > { %p965_p8 = por %p964_p3, %p963_p6 }
  0xa5   : > { %p966_p9 = pnand %p965_p8, %p959_p1 }
  0xa7   : > { %969 = shalt.err (!%p966_p9)
}
  0xa8   : > { %s970_s26 = scalar_lea.hbm %s1413_s6, 640  ;;  %s974_s10 = scalar_lea.hbm %s1574_s3, 1280 }
  0xa9   : > { %p971_p10 = scmp.ne.s32.totalorder %s1413_s6, %s970_s26  ;;  %p975_p0 = scmp.lt.s32.totalorder %s1413_s6, %s1574_s3 }
  0xaa   : > { %p976_p4 = scmp.lt.s32.totalorder %s974_s10, %s970_s26 }
  0xab   : > { %p972_p11 = pnand %p971_p10, %p1261_p12 }
  0xac   : > { %p977_p7 = por %p976_p4, %p975_p0 }
  0xad   : > { %p973_p13 = pneg %p972_p11 }
  0xaf   : > { %p978_p5 = pnand %p977_p7, %p973_p13 }
  0xb1   : > { %981 = shalt.err (!%p978_p5)
}
  0xb2   : > { %s1146_s18 = smov 128   ;;  %s1147_s28 = smov 8   ;;  %739 = vst [vmem:[%s1339_s13 + $0x18] sm:$0xff] %v429_v12 }
  0xb3   : > { %769 = dma.vmem_to_hbm [thread:$0]  (%p1261_p12), %s1423_s9, 640, %s1413_s6, %s1455_s7, %s1146_s18, %s1146_s18, %s1147_s28  }
  0xb4   : > { %s982_s4 = scalar_lea.vmem %s1437_s22, 640  ;;  %s1148_s14 = smov [#allocation10]  }
  0xb5   : > { %p983_p1 = scmp.ne.s32.totalorder %s1437_s22, %s982_s4  ;;  %s986_s17 = sshll.u32 %s1148_s14, 4  ;;  %s987_s17 = int_to_ptr.vmem [resolvable:$false] %s986_s17 }
  0xb6   : > { %s988_s30 = scalar_lea.vmem %s987_s17, 1280  ;;  %p989_p8 = scmp.lt.s32.totalorder %s1437_s22, %s987_s17 }
  0xb7   : > { %p984_p6 = pnand %p983_p1, %p1261_p12  ;;  %p990_p9 = scmp.lt.s32.totalorder %s988_s30, %s982_s4 }
  0xb9   : > { %p985_p3 = pneg %p984_p6  ;;  %p991_p10 = por %p990_p9, %p989_p8 }
  0xbb   : > { %p992_p11 = pnand %p991_p10, %p985_p3 }
  0xbd   : > { %995 = shalt.err (!%p992_p11)
}
  0xbe   : > { %s996_s9 = scalar_lea.hbm %s1435_s15, 640  ;;  %s1000_s21 = scalar_lea.hbm %s1607_s0, 1280 }
  0xbf   : > { %p997_p13 = scmp.ne.s32.totalorder %s1435_s15, %s996_s9  ;;  %p1001_p7 = scmp.lt.s32.totalorder %s1435_s15, %s1607_s0 }
  0xc0   : > { %p1002_p5 = scmp.lt.s32.totalorder %s1000_s21, %s996_s9 }
  0xc1   : > { %p998_p0 = pnand %p997_p13, %p1261_p12 }
  0xc2   : > { %p1003_p1 = por %p1002_p5, %p1001_p7 }
  0xc3   : > { %p999_p4 = pneg %p998_p0 }
  0xc5   : > { %p1004_p6 = pnand %p1003_p1, %p999_p4 }
  0xc7   : > { %1007 = shalt.err (!%p1004_p6)
}
  0xc8   : > { %770 = dma.vmem_to_hbm [thread:$0]  (%p1261_p12), %s1437_s22, 640, %s1435_s15, %s1455_s7, %s1146_s18, %s1146_s18, %s1147_s28  }
  0xc9   : > { %746 = vst [vmem:[%s1339_s13 + $0x20] sm:$0xff] %v446_v14  ;;  %s459_s27 = scalar_lea.sflag [#allocation4], %s298_s2  ;;  %s1008_s12 = scalar_lea.vmem %s1448_s5, 640 }
  0xca   : > { %p1009_p3 = scmp.ne.s32.totalorder %s1448_s5, %s1008_s12  ;;  %s1149_s4 = smov [#allocation7]  }
  0xcb   : > { %s1012_s14 = sshll.u32 %s1149_s4, 4  ;;  %s1013_s14 = int_to_ptr.vmem [resolvable:$false] %s1012_s14 }
  0xcc   : > { %p1010_p8 = pnand %p1009_p3, %p1261_p12  ;;  %s1014_s17 = scalar_lea.vmem %s1013_s14, 1280 }
  0xcd   : > { %p1015_p10 = scmp.lt.s32.totalorder %s1448_s5, %s1013_s14  ;;  %p1016_p11 = scmp.lt.s32.totalorder %s1014_s17, %s1008_s12 }
  0xce   : > { %p1011_p9 = pneg %p1010_p8 }
  0xcf   : > { %p1017_p13 = por %p1016_p11, %p1015_p10 }
  0xd1   : > { %p1018_p0 = pnand %p1017_p13, %p1011_p9 }
  0xd3   : > { %1021 = shalt.err (!%p1018_p0)
}
  0xd4   : > { %s1022_s13 = scalar_lea.hbm %s1446_s29, 640  ;;  %s1026_s15 = scalar_lea.hbm %s1608_s11, 1280 }
  0xd5   : > { %p1023_p4 = scmp.ne.s32.totalorder %s1446_s29, %s1022_s13  ;;  %p1027_p1 = scmp.lt.s32.totalorder %s1446_s29, %s1608_s11 }
  0xd6   : > { %p1028_p6 = scmp.lt.s32.totalorder %s1026_s15, %s1022_s13 }
  0xd7   : > { %p1024_p7 = pnand %p1023_p4, %p1261_p12 }
  0xd8   : > { %p1029_p3 = por %p1028_p6, %p1027_p1 }
  0xd9   : > { %p1025_p5 = pneg %p1024_p7 }
  0xdb   : > { %p1030_p8 = pnand %p1029_p3, %p1025_p5 }
  0xdd   : > { %1033 = shalt.err (!%p1030_p8)
}
  0xde   : > { %768 = dma.vmem_to_hbm [thread:$0]  (%p1261_p12), %s1448_s5, 640, %s1446_s29, %s459_s27, %s1146_s18, %s1146_s18, %s1147_s28  }
  0xdf PF: > { %s1609_s9 = sld [smem:[#allocation15_spill]]  ;;  %p792_p9 = scmp.ge.s32.totalorder %s1136_s25, 2 }
  0xe1   : > { %p782_p10 = pnand %p792_p9, %p1276_p2 }
  0xe3   : > { %p783_p11 = pneg %p782_p10 }
  0xe5   : > { %s535_s26 = sand.u32 1, %s1609_s9  }
  0xe6   : > { %s536_s21 = scalar_lea.sflag [#allocation4], %s535_s26 }
  0xe7   : > { %1087 = dma.done.wait (%p783_p11), %s536_s21, 640  }
  0xe8   : > { %1089 = vsyncadd (%p783_p11), %s536_s21, 4294966656  ;;  %s1611_s20 = sadd.s32 4294967294, %s1136_s25  }
  0xe9   : > { %s544_s8 = sand.u32 1, %s1611_s20  }
  0xea   : > { %s545_s10 = scalar_lea.sflag [#allocation9], %s544_s8 }
  0xeb   : > { %1091 = dma.done.wait (%p783_p11), %s545_s10, 1280  }
  0xec   : > { %1093 = vsyncadd (%p783_p11), %s545_s10, 4294966016  ;;  %s27_s25 = sadd.s32 1, %s1136_s25   ;;  %s1612_s5 = sld [smem:[#allocation16_spill]] }
  0xed   : > { %p24_p12 = scmp.ge.s32.totalorder %s27_s25, 10   ;;  %s1613_s17 = sld [smem:[#allocation21_spill]] }
  0xee   : > { %s1614_s29 = sld [smem:[#allocation17_spill]]  ;;  %s1618_s15 = smov %s1100_s16 }
  0xef   : > { %s1615_s20 = sld [smem:[#allocation22_spill]]  ;;  %s1620_s18 = smov %s1112_s19 }
  0xf0   : > { %s1616_s28 = sld [smem:[#allocation18_spill]]  ;;  %s1622_s21 = smov %s1128_s23 }
  0xf1   : > { %s1617_s27 = sld [smem:[#allocation19_spill]]  ;;  %s1623_s22 = smov %s1132_s24 }
  0xf2   : > { %s1619_s16 = smov %s1612_s5 }
  0xf3   :  { %26 = sbr.rel (!%p24_p12) target bundleno = 17 (0x11), region = 138 }
  0xf4   : > { %s1621_s19 = smov %s1614_s29 }
  0xf6   : > { %s1624_s23 = smov %s1616_s28 }
  0xf7   : > { %s1625_s24 = smov %s1617_s27 }
  0xf8   :  { %559 = vsyncpa [#allocation3], 1 }
  0xf9   :  { %561 = vsyncpa [#allocation3 + $0x1], 1 }
  0xfa   :  { %562 = vsyncpa [#allocation6], 1 }
  0xfb   :  { %564 = vsyncpa [#allocation6 + $0x1], 1 }
  0xfc   :  { %565 = vsyncpa [#allocation4], 1 }
  0xfd   :  { %567 = vsyncpa [#allocation4 + $0x1], 1 }
  0xfe   :  { %568 = vsyncpa [#allocation9], 1 }
  0xff   :  { %570 = vsyncpa [#allocation9 + $0x1], 1 }

</bundles_post_ra>
